<compile_context>
chip_gen: v5e
topology: v5e:2x2
jax: 0.10.0
libtpu: 0.0.40
codegen_flags: <defaults>
</compile_context>

<pallas_src>
import functools

import jax
import jax.numpy as jnp
from jax.experimental import pallas as pl
from jax.experimental.pallas import tpu as pltpu


# ----------------------------- Pallas kernel --------------------------------

def _fused_conv_in_lrelu_kernel(x_ref, w_ref, gamma_ref, beta_ref, out_ref, *,
                                kh, w_out, eps, negative_slope):
    """Per-sample fused Conv2d + InstanceNorm2d(affine) + LeakyReLU.

    x_ref:     [1, kw*C_in, Hp*W_out]   column-shifted padded input (one sample)
    w_ref:     [kh, C_out, kw*C_in]     conv weight regrouped per vertical tap
    gamma_ref: [C_out, 1]               instance-norm scale
    beta_ref:  [C_out, 1]               instance-norm shift
    out_ref:   [1, C_out, H_out*W_out]  lane-dense output (HW on the lane axis)
    """
    c_out = out_ref.shape[1]
    hw = out_ref.shape[2]

    x = x_ref[0]                                   # [kw*C_in, Hp*W_out]

    # Convolution: kh accumulating MXU matmuls; vertical tap i is a contiguous
    # lane slice of length HW starting at i*W_out.
    acc = jnp.zeros((c_out, hw), dtype=jnp.float32)
    for i in range(kh):                            # static, unrolled
        xs = x[:, i * w_out: i * w_out + hw]       # [kw*C_in, HW]
        acc = acc + jnp.dot(w_ref[i], xs,
                            preferred_element_type=jnp.float32)

    # InstanceNorm2d (biased variance, eps inside rsqrt), stats in f32.
    mean = jnp.mean(acc, axis=-1, keepdims=True)   # [C_out, 1]
    xc = acc - mean                                # reuse centered tensor
    var = jnp.mean(xc * xc, axis=-1, keepdims=True)
    scale = gamma_ref[...] * jax.lax.rsqrt(var + eps)   # fused gamma * rsqrt
    y = xc * scale + beta_ref[...]

    # LeakyReLU.
    y = jnp.where(y >= 0.0, y, negative_slope * y)

    out_ref[0] = y.astype(out_ref.dtype)


# ------------------------------- Wrapper ------------------------------------

def conv_layer_forward(x_nchw, weight, gamma, beta, *, stride=1,
                       negative_slope=0.01, eps=1e-5,
                       compute_dtype=jnp.float32):
    """x_nchw: [N, C_in, H, W]; weight: [C_out, C_in, kh, kw]; gamma/beta: [C_out].

    Returns NCHW float32, matching PyTorch ConvLayer.forward semantics.
    Set compute_dtype=jnp.bfloat16 for v6e/v7x MXU throughput (f32 accumulate).
    """
    N, C_in, H, W = x_nchw.shape
    C_out, _, kh, kw = weight.shape
    assert stride == 1, "this synthetic instantiation uses stride=1"
    assert kh == kw, "square kernel assumed (matches the module instantiation)"
    pad = int((kh - stride + 1) / 2)               # get_padding
    H_out, W_out = H, W                            # stride 1, 'same'-style padding
    HW = H_out * W_out
    Hp = H + 2 * pad

    # --- cheap layout prep in XLA (no kh*kw im2col expansion) ----------------
    x_pad = jnp.pad(x_nchw, ((0, 0), (0, 0), (pad, pad), (pad, pad)))
    # For each horizontal tap j: slice columns [j, j+W) and flatten (Hp, W) so a
    # vertical tap i becomes the contiguous lane window [i*W, i*W + HW).
    cols = [
        x_pad[:, :, :, j:j + W_out].reshape(N, C_in, Hp * W_out)
        for j in range(kw)
    ]
    x_col = jnp.concatenate(cols, axis=1).astype(compute_dtype)   # [N, kw*C_in, Hp*W]

    # weight[o, c, i, j] -> w_taps[i, o, j*C_in + c]  (matches x_col row order)
    w_taps = jnp.transpose(weight, (2, 0, 3, 1)).reshape(
        kh, C_out, kw * C_in).astype(compute_dtype)

    gamma2 = gamma.reshape(C_out, 1).astype(jnp.float32)
    beta2 = beta.reshape(C_out, 1).astype(jnp.float32)

    kernel = functools.partial(
        _fused_conv_in_lrelu_kernel,
        kh=kh, w_out=W_out, eps=eps, negative_slope=negative_slope,
    )

    out_flat = pl.pallas_call(
        kernel,
        out_shape=jax.ShapeDtypeStruct((N, C_out, HW), jnp.float32),
        grid_spec=pltpu.PrefetchScalarGridSpec(
            num_scalar_prefetch=0,
            grid=(N,),
            in_specs=[
                pl.BlockSpec((1, kw * C_in, Hp * W_out), lambda n: (n, 0, 0)),
                pl.BlockSpec((kh, C_out, kw * C_in), lambda n: (0, 0, 0)),
                pl.BlockSpec((C_out, 1), lambda n: (0, 0)),
                pl.BlockSpec((C_out, 1), lambda n: (0, 0)),
            ],
            out_specs=pl.BlockSpec((1, C_out, HW), lambda n: (n, 0, 0)),
        ),
        compiler_params=pltpu.CompilerParams(
            dimension_semantics=("parallel",),   # megacore sharding on v7x
        ),
    )(x_col, w_taps, gamma2, beta2)

    return out_flat.reshape(N, C_out, H_out, W_out)


# --------------------------------- Main --------------------------------------

if __name__ == "__main__":
    # Deterministic parameters / inputs (synthetic; no checkpoint loading).
    key = jax.random.PRNGKey(0)
    k_x, k_w = jax.random.split(key)

    N, C_in, H, W = 2, 4, 16, 16
    C_out, kh, kw = 8, 3, 3

    x = jax.random.normal(k_x, (N, C_in, H, W), dtype=jnp.float32)
    # Kaiming-uniform-ish deterministic conv weight (bias=False in the module).
    fan_in = C_in * kh * kw
    bound = 1.0 / jnp.sqrt(jnp.float32(fan_in))
    weight = jax.random.uniform(
        k_w, (C_out, C_in, kh, kw), minval=-bound, maxval=bound, dtype=jnp.float32
    )
    # InstanceNorm2d affine params: PyTorch init is gamma=1, beta=0.
    gamma = jnp.ones((C_out,), dtype=jnp.float32)
    beta = jnp.zeros((C_out,), dtype=jnp.float32)

    out = conv_layer_forward(
        x, weight, gamma, beta, stride=1, negative_slope=0.01, eps=1e-5
    )
    jax.block_until_ready(out)
    assert out.shape == (N, C_out, H, W)
    print("KERNEL_OK")
</pallas_src>

<mosaic_0001>
module attributes {stable_mosaic.version = 11 : i64} {
  func.func @_fused_conv_in_lrelu_kernel(%arg0: i32, %arg1: memref<1x12x288xf32, #tpu.memory_space<vmem>>, %arg2: memref<3x8x12xf32, #tpu.memory_space<vmem>>, %arg3: memref<8x1xf32, #tpu.memory_space<vmem>>, %arg4: memref<8x1xf32, #tpu.memory_space<vmem>>, %arg5: memref<1x8x256xf32, #tpu.memory_space<vmem>>) attributes {dimension_semantics = [#tpu.dimension_semantics<parallel>], iteration_bounds = array<i64: 2>, scalar_prefetch = 0 : i64, scratch_operands = 0 : i64, tpu.core_type = #tpu.core_type<tc>, window_params = [{transform_indices = @transform_0, window_bounds = array<i64: 1, 12, 288>}, {pipeline_mode = #tpu.pipeline_mode<synchronous>, transform_indices = @transform_1, window_bounds = array<i64: 3, 8, 12>}, {pipeline_mode = #tpu.pipeline_mode<synchronous>, transform_indices = @transform_2, window_bounds = array<i64: 8, 1>}, {pipeline_mode = #tpu.pipeline_mode<synchronous>, transform_indices = @transform_3, window_bounds = array<i64: 8, 1>}, {transform_indices = @transform_4, window_bounds = array<i64: 1, 8, 256>}]} {
    %c0 = arith.constant 0 : index
    %c0_0 = arith.constant 0 : index
    %c0_1 = arith.constant 0 : index
    %0 = vector.load %arg1[%c0, %c0_0, %c0_1] : memref<1x12x288xf32, #tpu.memory_space<vmem>>, vector<1x12x288xf32>
    %1 = vector.shape_cast %0 : vector<1x12x288xf32> to vector<12x288xf32>
    %cst = arith.constant 0.000000e+00 : f32
    %2 = vector.broadcast %cst : f32 to vector<8x256xf32>
    %3 = vector.extract_strided_slice %1 {offsets = [0, 0], sizes = [12, 256], strides = [1, 1]} : vector<12x288xf32> to vector<12x256xf32>
    %c0_2 = arith.constant 0 : index
    %c0_3 = arith.constant 0 : index
    %c0_4 = arith.constant 0 : index
    %4 = vector.load %arg2[%c0_2, %c0_3, %c0_4] : memref<3x8x12xf32, #tpu.memory_space<vmem>>, vector<1x8x12xf32>
    %5 = vector.shape_cast %4 : vector<1x8x12xf32> to vector<8x12xf32>
    %cst_5 = arith.constant dense<0.000000e+00> : vector<8x256xf32>
    %6 = tpu.matmul %5, %3, %cst_5 {dimension_numbers = #tpu.dot_dimension_numbers<[1], [0], [0], [1], [0, 0, 1, 1], [], []>} : vector<8x12xf32>, vector<12x256xf32>, vector<8x256xf32> -> vector<8x256xf32>
    %7 = arith.addf %2, %6 : vector<8x256xf32>
    %8 = vector.extract_strided_slice %1 {offsets = [0, 16], sizes = [12, 256], strides = [1, 1]} : vector<12x288xf32> to vector<12x256xf32>
    %c1 = arith.constant 1 : index
    %c0_6 = arith.constant 0 : index
    %c0_7 = arith.constant 0 : index
    %9 = vector.load %arg2[%c1, %c0_6, %c0_7] : memref<3x8x12xf32, #tpu.memory_space<vmem>>, vector<1x8x12xf32>
    %10 = vector.shape_cast %9 : vector<1x8x12xf32> to vector<8x12xf32>
    %cst_8 = arith.constant dense<0.000000e+00> : vector<8x256xf32>
    %11 = tpu.matmul %10, %8, %cst_8 {dimension_numbers = #tpu.dot_dimension_numbers<[1], [0], [0], [1], [0, 0, 1, 1], [], []>} : vector<8x12xf32>, vector<12x256xf32>, vector<8x256xf32> -> vector<8x256xf32>
    %12 = arith.addf %7, %11 : vector<8x256xf32>
    %13 = vector.extract_strided_slice %1 {offsets = [0, 32], sizes = [12, 256], strides = [1, 1]} : vector<12x288xf32> to vector<12x256xf32>
    %c2 = arith.constant 2 : index
    %c0_9 = arith.constant 0 : index
    %c0_10 = arith.constant 0 : index
    %14 = vector.load %arg2[%c2, %c0_9, %c0_10] : memref<3x8x12xf32, #tpu.memory_space<vmem>>, vector<1x8x12xf32>
    %15 = vector.shape_cast %14 : vector<1x8x12xf32> to vector<8x12xf32>
    %cst_11 = arith.constant dense<0.000000e+00> : vector<8x256xf32>
    %16 = tpu.matmul %15, %13, %cst_11 {dimension_numbers = #tpu.dot_dimension_numbers<[1], [0], [0], [1], [0, 0, 1, 1], [], []>} : vector<8x12xf32>, vector<12x256xf32>, vector<8x256xf32> -> vector<8x256xf32>
    %17 = arith.addf %12, %16 : vector<8x256xf32>
    %cst_12 = arith.constant dense<0.000000e+00> : vector<8xf32>
    %18 = vector.multi_reduction <add>, %17, %cst_12 [1] : vector<8x256xf32> to vector<8xf32>
    %19 = vector.shape_cast %18 : vector<8xf32> to vector<8x1xf32>
    %cst_13 = arith.constant 2.560000e+02 : f32
    %20 = vector.broadcast %cst_13 : f32 to vector<8x1xf32>
    %21 = arith.divf %19, %20 : vector<8x1xf32>
    %22 = vector.broadcast %21 : vector<8x1xf32> to vector<8x256xf32>
    %23 = arith.subf %17, %22 : vector<8x256xf32>
    %24 = arith.mulf %23, %23 : vector<8x256xf32>
    %cst_14 = arith.constant dense<0.000000e+00> : vector<8xf32>
    %25 = vector.multi_reduction <add>, %24, %cst_14 [1] : vector<8x256xf32> to vector<8xf32>
    %26 = vector.shape_cast %25 : vector<8xf32> to vector<8x1xf32>
    %cst_15 = arith.constant 2.560000e+02 : f32
    %27 = vector.broadcast %cst_15 : f32 to vector<8x1xf32>
    %28 = arith.divf %26, %27 : vector<8x1xf32>
    %c0_16 = arith.constant 0 : index
    %c0_17 = arith.constant 0 : index
    %29 = vector.load %arg3[%c0_16, %c0_17] : memref<8x1xf32, #tpu.memory_space<vmem>>, vector<8x1xf32>
    %cst_18 = arith.constant 9.99999974E-6 : f32
    %30 = vector.broadcast %cst_18 : f32 to vector<8x1xf32>
    %31 = arith.addf %28, %30 : vector<8x1xf32>
    %32 = math.rsqrt %31 : vector<8x1xf32>
    %33 = arith.mulf %29, %32 : vector<8x1xf32>
    %34 = vector.broadcast %33 : vector<8x1xf32> to vector<8x256xf32>
    %35 = arith.mulf %23, %34 : vector<8x256xf32>
    %c0_19 = arith.constant 0 : index
    %c0_20 = arith.constant 0 : index
    %36 = vector.load %arg4[%c0_19, %c0_20] : memref<8x1xf32, #tpu.memory_space<vmem>>, vector<8x1xf32>
    %37 = vector.broadcast %36 : vector<8x1xf32> to vector<8x256xf32>
    %38 = arith.addf %35, %37 : vector<8x256xf32>
    %cst_21 = arith.constant 0.000000e+00 : f32
    %39 = vector.broadcast %cst_21 : f32 to vector<8x256xf32>
    %40 = arith.cmpf oge, %38, %39 : vector<8x256xf32>
    %cst_22 = arith.constant 0.00999999977 : f32
    %41 = vector.broadcast %cst_22 : f32 to vector<8x256xf32>
    %42 = arith.mulf %41, %38 : vector<8x256xf32>
    %43 = arith.select %40, %38, %42 : vector<8x256xi1>, vector<8x256xf32>
    %c0_23 = arith.constant 0 : index
    %c0_24 = arith.constant 0 : index
    %c0_25 = arith.constant 0 : index
    %44 = vector.load %arg5[%c0_23, %c0_24, %c0_25] : memref<1x8x256xf32, #tpu.memory_space<vmem>>, vector<1x8x256xf32>
    %45 = vector.shape_cast %44 : vector<1x8x256xf32> to vector<8x256xf32>
    %46 = vector.shape_cast %43 : vector<8x256xf32> to vector<1x8x256xf32>
    tpu.vector_store %arg5[%c0_23, %c0_24, %c0_25], %46 {strides = array<i32>} : memref<1x8x256xf32, #tpu.memory_space<vmem>>, vector<1x8x256xf32>,
    return
  }
  func.func @transform_0(%arg0: i32) -> (i32, i32, i32) {
    %c0_i32 = arith.constant 0 : i32
    %c0_i32_0 = arith.constant 0 : i32
    %c0_i32_1 = arith.constant 0 : i32
    return %arg0, %c0_i32, %c0_i32_0 : i32, i32, i32
  }
  func.func @transform_1(%arg0: i32) -> (i32, i32, i32) {
    %c0_i32 = arith.constant 0 : i32
    %c0_i32_0 = arith.constant 0 : i32
    %c0_i32_1 = arith.constant 0 : i32
    %c0_i32_2 = arith.constant 0 : i32
    return %c0_i32, %c0_i32_0, %c0_i32_1 : i32, i32, i32
  }
  func.func @transform_2(%arg0: i32) -> (i32, i32) {
    %c0_i32 = arith.constant 0 : i32
    %c0_i32_0 = arith.constant 0 : i32
    %c0_i32_1 = arith.constant 0 : i32
    return %c0_i32, %c0_i32_0 : i32, i32
  }
  func.func @transform_3(%arg0: i32) -> (i32, i32) {
    %c0_i32 = arith.constant 0 : i32
    %c0_i32_0 = arith.constant 0 : i32
    %c0_i32_1 = arith.constant 0 : i32
    return %c0_i32, %c0_i32_0 : i32, i32
  }
  func.func @transform_4(%arg0: i32) -> (i32, i32, i32) {
    %c0_i32 = arith.constant 0 : i32
    %c0_i32_0 = arith.constant 0 : i32
    %c0_i32_1 = arith.constant 0 : i32
    return %arg0, %c0_i32, %c0_i32_0 : i32, i32, i32
  }
}

</mosaic_0001>

<bundles_post_ra>
// kernel: tpu_custom_call.1
= control target key start
LH: loop header
LB: loop body
LE: loop exit
PB: predicated region body
PF: predicated region fallthrough
CT: control target
= control target key end

     0   :  { %9 = vsyncpa [#allocation3], 0  ;;  %s817_s0 = inlined_call_operand.vmem [shape: f32[2,12,288], index: 0, kind: input, shape index: {}]   ;;  %s818_s1 = inlined_call_operand.vmem [shape: f32[3,8,12], index: 1, kind: input, shape index: {}]   ;;  %s819_s2 = inlined_call_operand.vmem [shape: f32[8,1], index: 2, kind: input, shape index: {}]   ;;  %s820_s3 = inlined_call_operand.vmem [shape: f32[8,1], index: 3, kind: input, shape index: {}]   ;;  %s821_s4 = inlined_call_operand.hbm [shape: f32[2,8,256], index: 4, kind: output, shape index: {}]  }
   0x1   :  { %11 = vsyncpa [#allocation3 + $0x1], 0  ;;  %s705_s15 = smov 0   ;;  %s707_s16 = smov 0  }
   0x2   :  { %s709_s17 = smov 0   ;;  %s711_s18 = smov 0  }
   0x3 LB: > { %s726_s19 = sadd.s32 4294967295, %s674_s18   ;;  %s527_s20 = sadd.s32 4294967294, %s674_s18   ;;  %s674_s18 = sphi %s711_s18, %s827_s18   ;;  %s670_s17 = sphi %s709_s17, %s826_s17   ;;  %s666_s16 = sphi %s707_s16, %s825_s16   ;;  %s662_s15 = sphi %s705_s15, %s824_s15  }
   0x4   : > { %s730_s21 = sadd.s32 1, %s674_s18   ;;  %s113_s22 = sadd.s32 1, %s670_s17 }
   0x5   : > { %s110_s23 = ssub.s32 %s674_s18, %s730_s21  ;;  %p123_p0 = scmp.ne.s32.totalorder %s670_s17, %s666_s16 }
   0x6   : > { %p111_p1 = scmp.eq.s32.totalorder %s110_s23, 0  ;;  %p124_p2 = scmp.eq.s32.totalorder %s726_s19, 1 }
   0x7   : > { %p129_p3 = scmp.ne.s32.totalorder %s666_s16, %s662_s15  ;;  %p130_p4 = scmp.eq.s32.totalorder %s527_s20, 1 }
   0x8   : > { %s741_s24 = scalar_select %p111_p1, %s670_s17, %s113_s22  }
   0x9   : > { %p743_p5 = por %p124_p2, %p123_p0  ;;  %p747_p6 = por %p130_p4, %p129_p3 }
   0xa   : > { %p530_p7 = scmp.ge.s32.totalorder %s674_s18, 1  ;;  %p165_p8 = scmp.lt.s32.totalorder %s674_s18, 3 }
   0xc   : > { %p166_p9 = pnand %p530_p7, %p165_p8 }
   0xd   : > { %p191_p10 = scmp.lt.s32.totalorder (!%p166_p9), %s726_s19, 1  ;;  %s676_s6 = smov (!%p166_p9), 112  }
   0xe   : > { %169 = sbr.rel (%p166_p9) target bundleno = 692 (0x2b4), region = 36  ;;  %s677_s7 = smov (!%p166_p9), 96  }
   0xf   : > { %s552_s29 = sshll.u32 (!%p166_p9), %s726_s19, 4  ;;  %s632_s14 = scalar_lea.hbm (!%p166_p9), %s821_s4, 32 }
  0x13   : > { %s192_s27 = scalar_select %p191_p10, %s726_s19, 1  ;;  %vm234_vm0 = vcmask 1043456   ;;  %v202_v7 = vld [vmem:[%s818_s1] sm:$0xff]  ;;  %vm230_vm1 = vcmask 97280   ;;  %vm223_vm2 = vcmask 916480   ;;  %v533_v18 = vld [vmem:[%s818_s1 + $0x8] sm:$0xff] }
  0x14   : > { %vm340_vm3 = vcmask 785408   ;;  %v542_v29 = vld [vmem:[%s818_s1 + $0x10] sm:$0xff]  ;;  %v678_v43 = vmov 256.0   ;;  %v679_v57 = vmov 0  }
  0x15   : > { %s553_s28 = smul.u32 48, %s192_s27  ;;  %608 = vrcp.f32 %v678_v43  ;;  %607 = vset.pattern.permute.xlu0 %v679_v57  ;;  %s188_s27 = sand.u32 1, %s666_s16  }
  0x16   : > { %s452_s19 = scalar_lea.sflag [#allocation3], %s188_s27 }
  0x17   : > { %s195_s5 = scalar_lea.vmem %s817_s0, %s553_s28  ;;  %s531_s28 = sshll.u32 %s188_s27, 4 }
  0x18   : > { %v201_v0 = vld [vmem:[%s195_s5 + $0x28] sm:$0xf]  ;;  %v199_v1 = vld [vmem:[%s195_s5 + $0x18] sm:$0xf]  ;;  %v196_v2 = vld [vmem:[%s195_s5] sm:$0xff] }
  0x19   : > { %221 = vrot.lane.b32.xlu1 %v201_v0, %s676_s6  ;;  %217 = vrot.lane.b32.xlu0 %v199_v1, %s676_s6  ;;  %v197_v3 = vld [vmem:[%s195_s5 + $0x8] sm:$0xff]  ;;  %v198_v4 = vld [vmem:[%s195_s5 + $0x10] sm:$0xff] }
  0x1a   : > { %215 = vrot.lane.b32.xlu2 %v198_v4, %s676_s6  ;;  %v597_v5 = vpack.i.bf16 %v197_v3, %v196_v2  ;;  %v200_v6 = vld [vmem:[%s195_s5 + $0x20] sm:$0xf]  ;;  %538 = vmatpush.msk.msra.mxu2 %vm234_vm0, %v199_v1 }
  0x1b   : > { %540 = vmatpush.msk.msra.mxu3 %vm234_vm0, %v200_v6  ;;  %v609_v44 = vpop.eup %608 }
  0x1c   : > { %301 = vmatpush.msra.mxu2 %v196_v2  ;;  %v400_v45 = vmul.f32 256.0, %v609_v44  ;;  %vm404_vm4 = vweird.f32 %v609_v44  ;;  %v415_v2 = vld [vmem:[%s819_s2] sm:$0xff] }
  0x1d   : > { %321 = vmatpush.msra.mxu3 %v197_v3  ;;  %539 = vmatmul.msk.f32.vlgmr.msra.gmra.mxu2 %vm230_vm1, %v202_v7 }
  0x1e   : > { %541 = vmatmul.msk.f32.vlgmr.msra.gmra.mxu3 %vm230_vm1, %v202_v7  ;;  %v401_v46 = vsub.f32 1.0, %v400_v45 }
  0x20   : > { %v402_v47 = vmul.f32 %v609_v44, %v401_v46 }
  0x21   : > { %219 = vrot.lane.b32.xlu0 %v200_v6, %s676_s6  ;;  %598 = vrot.lane.b32.xlu1 %v597_v5, %s676_s6  ;;  %s463_s6 = scalar_lea.hbm %s821_s4, %s552_s29 }
  0x22   : > { %334 = vrot.lane.b32.xlu2 %v199_v1, %s677_s7  ;;  %v403_v48 = vadd.f32 %v609_v44, %v402_v47  ;;  %s467_s9 = sshll.u32 %s463_s6, 4  ;;  %s468_s9 = int_to_ptr.hbm [resolvable:$true] %s467_s9 }
  0x23   : > { %s626_s10 = sshra.s32 %s468_s9, 4  ;;  %s627_s10 = int_to_ptr.hbm [resolvable:$true] %s626_s10 }
  0x24   : > { %v405_v49 = vsel %vm404_vm4, %v609_v44, %v403_v48  ;;  %s628_s11 = scalar_lea.hbm %s627_s10, 16  ;;  %p633_p0 = scmp.lt.s32.totalorder %s627_s10, %s821_s4 }
  0x25   : > { %p629_p11 = scmp.ne.s32.totalorder %s627_s10, %s628_s11  ;;  %p634_p1 = scmp.lt.s32.totalorder %s632_s14, %s628_s11 }
  0x27   : > { %p630_p12 = pnand %p629_p11, %p743_p5  ;;  %p635_p2 = por %p634_p1, %p633_p0 }
  0x29   : > { %336 = vrot.lane.b32.xlu0 %v200_v6, %s677_s7  ;;  %338 = vrot.lane.b32.xlu1 %v201_v0, %s677_s7  ;;  %v435_v6 = vld [vmem:[%s820_s3] sm:$0xff]  ;;  %p631_p13 = pneg %p630_p12 }
  0x2a   : > { %603 = vrot.lane.b32.xlu2 %v597_v5, %s677_s7 }
  0x2b   : > { %p636_p3 = pnand %p635_p2, %p631_p13 }
  0x31   : > { %332 = vrot.lane.b32.xlu0 %v198_v4, %s677_s7  ;;  %s190_s7 = scalar_lea.vmem [#allocation2], %s531_s28 }
  0x32   : > { %s465_s8 = sshll.u32 %s190_s7, 4  ;;  %s466_s8 = int_to_ptr.vmem [resolvable:$true] %s465_s8 }
  0x74   : > { %v216_v8 = vpop.permute.xlu2 %215 }
  0x7c   : > { %v335_v9 = vpop.permute.xlu2 %334 }
  0x84   : > { %v604_v19 = vpop.permute.xlu2 %603 }
  0x85   : > { %v606_v22 = vunpack.i.h.bf16 %v604_v19  ;;  %v605_v23 = vunpack.i.l.bf16 %v604_v19 }
  0x87   : > { %v341_v28 = vsel %vm340_vm3, %v605_v23, %v606_v22 }
  0x8b   : > { %v222_v10 = vpop.permute.xlu1 %221  ;;  %v218_v11 = vpop.permute.xlu0 %217 }
  0x93   : > { %v220_v12 = vpop.permute.xlu0 %219  ;;  %v599_v13 = vpop.permute.xlu1 %598 }
  0x94   : > { %v601_v14 = vunpack.i.h.bf16 %v599_v13  ;;  %v600_v15 = vunpack.i.l.bf16 %v599_v13  ;;  %v226_v16 = vsel %vm223_vm2, %v218_v11, %v220_v12  ;;  %v227_v17 = vsel %vm223_vm2, %v220_v12, %v222_v10 }
  0x95   : > { %534 = vmatpush.msk.msra.mxu0 %vm234_vm0, %v226_v16  ;;  %536 = vmatpush.msk.msra.mxu1 %vm234_vm0, %v227_v17 }
  0x96   : > { %v225_v20 = vsel %vm223_vm2, %v601_v14, %v216_v8  ;;  %v224_v21 = vsel %vm223_vm2, %v600_v15, %v601_v14 }
  0x97   : > { %274 = vmatpush.msra.mxu1 %v225_v20  ;;  %254 = vmatpush.msra.mxu0 %v224_v21 }
  0x98   : > { %535 = vmatmul.msk.f32.vlgmr.msra.gmra.mxu0 %vm230_vm1, %v533_v18  ;;  %537 = vmatmul.msk.f32.vlgmr.msra.gmra.mxu1 %vm230_vm1, %v533_v18 }
  0x9b   : > { %v337_v24 = vpop.permute.xlu0 %336  ;;  %v339_v25 = vpop.permute.xlu1 %338 }
  0x9c   : > { %v343_v26 = vsel %vm340_vm3, %v335_v9, %v337_v24  ;;  %v344_v27 = vsel %vm340_vm3, %v337_v24, %v339_v25 }
  0x9d   : > { %543 = vmatpush.msk.msrb.mxu0 %vm234_vm0, %v343_v26  ;;  %545 = vmatpush.msk.msrb.mxu1 %vm234_vm0, %v344_v27 }
  0x9f   : > { %369 = vmatpush.msrb.mxu0 %v341_v28 }
  0xa0   : > { %544 = vmatmul.msk.f32.vlgmr.msrb.gmra.mxu0 %vm230_vm1, %v542_v29  ;;  %v303_v34 = vpop.f32.mrf.mxu2 }
  0xa1   : > { %v323_v35 = vpop.f32.mrf.mxu3 }
  0xa3   : > { %v333_v30 = vpop.permute.xlu0 %332 }
  0xa4   : > { %v342_v31 = vsel %vm340_vm3, %v606_v22, %v333_v30 }
  0xa5   : > { %389 = vmatpush.msrb.mxu1 %v342_v31 }
  0xa6   : > { %546 = vmatmul.msk.f32.vlgmr.msrb.gmra.mxu1 %vm230_vm1, %v542_v29 }
 0x115   : > { %v256_v32 = vpop.f32.mrf.mxu0  ;;  %v276_v33 = vpop.f32.mrf.mxu1 }
 0x116   : > { %v304_v36 = vadd.f32 %v303_v34, %v256_v32  ;;  %v324_v38 = vadd.f32 %v323_v35, %v276_v33 }
 0x11d   : > { %v371_v37 = vpop.f32.mrf.mxu0 }
 0x11e   : > { %v394_v40 = vadd.f32 %v371_v37, %v304_v36 }
 0x123   : > { %v391_v39 = vpop.f32.mrf.mxu1 }
 0x124   : > { %v395_v41 = vadd.f32 %v391_v39, %v324_v38 }
 0x126   : > { %v396_v42 = vadd.f32 %v395_v41, %v394_v40 }
 0x128   : > { %397 = vadd.xlane.f32.xlu1 %v396_v42 }
 0x19b   : > { %v398_v50 = vpop.xlane.xlu1 %397 }
 0x19c   : > { %v406_v51 = vmul.f32 %v405_v49, %v398_v50 }
 0x19e   : > { %v407_v52 = vsub.f32 %v394_v40, %v406_v51  ;;  %v408_v53 = vsub.f32 %v395_v41, %v406_v51 }
 0x1a0   : > { %v409_v54 = vmul.f32 %v407_v52, %v407_v52  ;;  %v410_v55 = vmul.f32 %v408_v53, %v408_v53 }
 0x1a2   : > { %v411_v56 = vadd.f32 %v410_v55, %v409_v54 }
 0x1a4   : > { %412 = vadd.xlane.f32.xlu2 %v411_v56 }
 0x217   : > { %v413_v58 = vpop.xlane.xlu2 %412 }
 0x218   : > { %v414_v59 = vmul.f32 %v413_v58, %v405_v49 }
 0x21a   : > { %v416_v60 = vadd.f32 1e-05, %v414_v59 }
 0x21c   : > { %610 = vrsqrt.f32 %v416_v60  ;;  %vm423_vm6 = vweird.f32 %v416_v60 }
 0x222   : > { %v611_v61 = vpop.eup %610 }
 0x223   : > { %v418_v62 = vmul.f32 %v611_v61, %v416_v60  ;;  %vm424_vm5 = vweird.f32 %v611_v61 }
 0x224   : > { %vm425_vm7 = vmor %vm423_vm6, %vm424_vm5 }
 0x225   : > { %v419_v63 = vmul.f32 %v611_v61, %v418_v62 }
 0x227   : > { %v420_v0 = vmul.f32 0.5, %v419_v63 }
 0x229   : > { %v421_v1 = vsub.f32 1.5, %v420_v0 }
 0x22b   : > { %v422_v3 = vmul.f32 %v611_v61, %v421_v1 }
 0x22d   : > { %v426_v4 = vsel %vm425_vm7, %v611_v61, %v422_v3 }
 0x22e   : > { %v427_v5 = vmul.f32 %v426_v4, %v415_v2 }
 0x230   : > { %430 = vperm.xlu0 %607, %v427_v5  }
 0x238   : > { %438 = vperm.xlu0 %607, %v435_v6  }
 0x2a2   : > { %v431_v7 = vpop.permute.xlu0 %430 }
 0x2a3   : > { %v433_v8 = vmul.f32 %v431_v7, %v407_v52  ;;  %v434_v9 = vmul.f32 %v431_v7, %v408_v53 }
 0x2aa   : > { %v439_v10 = vpop.permute.xlu0 %438 }
 0x2ab   : > { %v441_v11 = vadd.f32 %v439_v10, %v433_v8  ;;  %v442_v12 = vadd.f32 %v439_v10, %v434_v9 }
 0x2ad   : > { %vm443_vm8 = vcmp.ge.f32.partialorder %v441_v11, 0.0  ;;  %vm444_vm9 = vcmp.ge.f32.partialorder %v442_v12, 0.0  ;;  %v445_v13 = vmul.f32 0.01, %v441_v11  ;;  %v446_v14 = vmul.f32 0.01, %v442_v12 }
 0x2af   : > { %v447_v15 = vsel %vm443_vm8, %v441_v11, %v445_v13  ;;  %v448_v16 = vsel %vm444_vm9, %v442_v12, %v446_v14 }
 0x2b0   : > { %449 = vst [vmem:[%s190_s7] sm:$0xff] %v447_v15 }
 0x2b1   : > { %450 = vst [vmem:[%s190_s7 + $0x8] sm:$0xff] %v448_v16 }
 0x2b2   : > { %639 = shalt.err (!%p636_p3)
}
 0x2b3   : > { %554 = dma.vmem_to_hbm [thread:$0]  (%p743_p5), %s466_s8, 256, %s468_s9, %s452_s19  }
 0x2b4 PF: > { %p560_p4 = scmp.ge.s32.totalorder %s674_s18, 2  ;;  %s479_s23 = sand.u32 1, %s662_s15  }
 0x2b5   : > { %s480_s27 = scalar_lea.sflag [#allocation3], %s479_s23 }
 0x2b6   : > { %p557_p7 = pnand %p560_p4, %p747_p6 }
 0x2b8   : > { %p558_p8 = pneg %p557_p7 }
 0x2ba   : > { %657 = dma.done.wait (%p558_p8), %s480_s27, 256  }
 0x2bb   : > { %659 = vsyncadd (%p558_p8), %s480_s27, 4294967040  ;;  %p14_p9 = scmp.ge.s32.totalorder %s730_s21, 4   ;;  %s824_s15 = smov %s666_s16 }
 0x2bc   : > { %s825_s16 = smov %s670_s17  ;;  %s826_s17 = smov %s741_s24 }
 0x2bd   : > { %s827_s18 = smov %s730_s21  ;;  %16 = sbr.rel (!%p14_p9) target bundleno = 3 (0x3), region = 73 }
 0x2c2   :  { %486 = vsyncpa [#allocation3], 1 }
 0x2c3   :  { %488 = vsyncpa [#allocation3 + $0x1], 1 }

</bundles_post_ra>
